<compile_context>
chip_gen: v6e
topology: v6e:2x2x1
jax: 0.10.0
libtpu: 0.0.40
codegen_flags: <defaults>
</compile_context>

<pallas_src>
import math

import jax
import jax.numpy as jnp
from jax import lax
from jax.experimental import pallas as pl
from jax.experimental.pallas import tpu as pltpu

LANE = 128     # lane width; hidden/output feature dims of the weights are padded to this
HIDDEN = 64    # logical hidden size of the PyTorch module
SUB_ROWS = 128 # in-kernel sub-block (keeps h1/h2 in vregs)


def _round_up(x, m):
    return ((x + m - 1) // m) * m


def _cdiv(a, b):
    return -(-a // b)


def dqn_kernel(x_ref, w1_ref, b1_ref, w2_ref, b2_ref, w3_ref, b3_ref, o_ref):
    tb = o_ref.shape[0]            # rows in this batch tile (static)
    out_cols = o_ref.shape[1]      # real output_size (static, == full last dim)
    sub = min(SUB_ROWS, tb)        # sub-block rows; wrapper guarantees tb % sub == 0
    n_sub = tb // sub

    def body(i, carry):
        r = pl.multiple_of(i * sub, sub)
        # Layer 1: Linear(input_size, 128-padded) + ReLU (bf16 MXU, f32 accumulate).
        # x arrives f32; cast to bf16 here (free VPU filler) instead of in the wrapper.
        xb = x_ref[pl.ds(r, sub), :].astype(jnp.bfloat16)
        h1 = jnp.dot(xb, w1_ref[...], preferred_element_type=jnp.float32)
        h1 = jnp.maximum(h1 + b1_ref[...], 0.0)
        # Layer 2: Linear(128, 128) + ReLU.
        h2 = jnp.dot(h1.astype(jnp.bfloat16), w2_ref[...],
                     preferred_element_type=jnp.float32)
        h2 = jnp.maximum(h2 + b2_ref[...], 0.0)
        # Layer 3: Linear(128, padded-out), no activation; only real columns are stored.
        o = jnp.dot(h2.astype(jnp.bfloat16), w3_ref[...],
                    preferred_element_type=jnp.float32)
        o = o + b3_ref[...]
        o_ref[pl.ds(r, sub), :] = o[:, :out_cols].astype(o_ref.dtype)
        return carry

    lax.fori_loop(0, n_sub, body, 0, unroll=True)


def _choose_tile(B, tile_b):
    """Pick a batch tile: sublane-aligned, multiple of SUB_ROWS when > SUB_ROWS, and
    (for v7x megacore) an even number of grid steps when the batch is big enough."""
    if B <= SUB_ROWS:
        return _round_up(B, 8)
    steps = max(2, _cdiv(B, tile_b))
    if steps % 2:
        steps += 1
    return _round_up(_cdiv(B, steps), SUB_ROWS)


def dqn_forward(x, params, output_size, tile_b=2048):
    """x: (B, input_size) float32.  params: lane-padded (see init_dqn_params).
    Returns (B, output_size) float32."""
    w1, b1, w2, b2, w3, b3 = params
    B, in_size = x.shape

    tb = _choose_tile(B, tile_b)
    assert tb % min(SUB_ROWS, tb) == 0
    grid = (_cdiv(B, tb),)

    resident = lambda arr: pl.BlockSpec(arr.shape, lambda i: (0, 0))

    out = pl.pallas_call(
        dqn_kernel,
        out_shape=jax.ShapeDtypeStruct((B, output_size), jnp.float32),
        grid=grid,
        in_specs=[
            # x tile, pipelined over batch; last dim == full array dim (no 128 pad needed).
            pl.BlockSpec((tb, in_size), lambda i: (i, 0)),
            resident(w1), resident(b1),
            resident(w2), resident(b2),
            resident(w3), resident(b3),
        ],
        # Narrow, unpadded output block: last dim == full array dim (masked vst, ~32x fewer
        # HBM bytes than the previous 128-lane f32 slab).
        out_specs=pl.BlockSpec((tb, output_size), lambda i: (i, 0)),
        compiler_params=pltpu.CompilerParams(
            dimension_semantics=("parallel",),  # batch axis shards across v7x's 2 TCs
        ),
    )(x, w1, b1, w2, b2, w3, b3)

    return out


def init_dqn_params(key, input_size, output_size, hidden=HIDDEN):
    """PyTorch-default nn.Linear init (uniform(+-1/sqrt(fan_in))), weights stored transposed
    as (in, out) with hidden/output feature dims zero-padded to a multiple of 128 lanes.
    Zero padding propagates exactly (0 through matmul/bias/ReLU)."""
    keys = jax.random.split(key, 6)

    def linear(kw, kb, fan_in, fan_out, pad_in, pad_out):
        bound = 1.0 / math.sqrt(fan_in)
        w = jax.random.uniform(kw, (fan_in, fan_out), jnp.float32, -bound, bound)
        b = jax.random.uniform(kb, (1, fan_out), jnp.float32, -bound, bound)
        w = jnp.pad(w, ((0, pad_in - fan_in), (0, pad_out - fan_out)))
        b = jnp.pad(b, ((0, 0), (0, pad_out - fan_out)))
        return w, b

    hid_p = _round_up(hidden, LANE)
    out_p = _round_up(output_size, LANE)
    w1, b1 = linear(keys[0], keys[1], input_size, hidden, input_size, hid_p)
    w2, b2 = linear(keys[2], keys[3], hidden, hidden, hid_p, hid_p)
    w3, b3 = linear(keys[4], keys[5], hidden, output_size, hid_p, out_p)
    # Matmul operands bf16 (halves weight HBM bytes, bf16 MXU path); biases f32 (v5e's VPU
    # has no bf16 VALU, keep the elementwise path on the native f32 units).
    return (w1.astype(jnp.bfloat16), b1,
            w2.astype(jnp.bfloat16), b2,
            w3.astype(jnp.bfloat16), b3)


def dqn_reference(x, params, output_size):
    """Pure-JAX reference mirroring the kernel's bf16-operand / f32-accumulate math."""
    w1, b1, w2, b2, w3, b3 = params
    xb = x.astype(jnp.bfloat16)
    h1 = jnp.maximum(jnp.dot(xb, w1, preferred_element_type=jnp.float32) + b1, 0.0)
    h2 = jnp.maximum(
        jnp.dot(h1.astype(jnp.bfloat16), w2, preferred_element_type=jnp.float32) + b2, 0.0)
    o = jnp.dot(h2.astype(jnp.bfloat16), w3, preferred_element_type=jnp.float32) + b3
    return o[:, :output_size]


if __name__ == "__main__":
    key = jax.random.PRNGKey(0)
    k_params, k_x = jax.random.split(key)

    batch = 8
    input_size = 16   # state dimension
    output_size = 4   # number of actions

    params = init_dqn_params(k_params, input_size, output_size)
    x = jax.random.normal(k_x, (batch, input_size), jnp.float32)

    out = dqn_forward(x, params, output_size)
    out = jax.block_until_ready(out)

    ref = dqn_reference(x, params, output_size)
    assert out.shape == (batch, output_size)
    assert jnp.allclose(out, ref, atol=2e-2, rtol=2e-2), "mismatch vs reference"

    print("KERNEL_OK")
</pallas_src>

<mosaic_0001>
module attributes {stable_mosaic.version = 11 : i64} {
  func.func @dqn_kernel(%arg0: i32, %arg1: memref<8x16xf32, #tpu.memory_space<vmem>>, %arg2: memref<16x128xbf16, #tpu.memory_space<vmem>>, %arg3: memref<1x128xf32, #tpu.memory_space<vmem>>, %arg4: memref<128x128xbf16, #tpu.memory_space<vmem>>, %arg5: memref<1x128xf32, #tpu.memory_space<vmem>>, %arg6: memref<128x128xbf16, #tpu.memory_space<vmem>>, %arg7: memref<1x128xf32, #tpu.memory_space<vmem>>, %arg8: memref<8x4xf32, #tpu.memory_space<vmem>>) attributes {dimension_semantics = [#tpu.dimension_semantics<parallel>], iteration_bounds = array<i64: 1>, scalar_prefetch = 0 : i64, scratch_operands = 0 : i64, tpu.core_type = #tpu.core_type<tc>, window_params = [{transform_indices = @transform_0, window_bounds = array<i64: 8, 16>}, {pipeline_mode = #tpu.pipeline_mode<synchronous>, transform_indices = @transform_1, window_bounds = array<i64: 16, 128>}, {pipeline_mode = #tpu.pipeline_mode<synchronous>, transform_indices = @transform_2, window_bounds = array<i64: 1, 128>}, {pipeline_mode = #tpu.pipeline_mode<synchronous>, transform_indices = @transform_3, window_bounds = array<i64: 128, 128>}, {pipeline_mode = #tpu.pipeline_mode<synchronous>, transform_indices = @transform_4, window_bounds = array<i64: 1, 128>}, {pipeline_mode = #tpu.pipeline_mode<synchronous>, transform_indices = @transform_5, window_bounds = array<i64: 128, 128>}, {pipeline_mode = #tpu.pipeline_mode<synchronous>, transform_indices = @transform_6, window_bounds = array<i64: 1, 128>}, {transform_indices = @transform_7, window_bounds = array<i64: 8, 4>}]} {
    %c0_i32 = arith.constant 0 : i32
    %c8_i32 = arith.constant 8 : i32
    %0 = arith.muli %c0_i32, %c8_i32 : i32
    %1 = tpu.assume_multiple %0, 8 : i32
    %2 = arith.index_cast %1 : i32 to index
    %c0 = arith.constant 0 : index
    %3 = vector.load %arg1[%2, %c0] : memref<8x16xf32, #tpu.memory_space<vmem>>, vector<8x16xf32>
    %4 = arith.truncf %3 : vector<8x16xf32> to vector<8x16xbf16>
    %c0_0 = arith.constant 0 : index
    %c0_1 = arith.constant 0 : index
    %5 = vector.load %arg2[%c0_0, %c0_1] : memref<16x128xbf16, #tpu.memory_space<vmem>>, vector<16x128xbf16>
    %cst = arith.constant dense<0.000000e+00> : vector<8x128xf32>
    %6 = tpu.matmul %4, %5, %cst {dimension_numbers = #tpu.dot_dimension_numbers<[1], [0], [0], [1], [0, 0, 1, 1], [], []>} : vector<8x16xbf16>, vector<16x128xbf16>, vector<8x128xf32> -> vector<8x128xf32>
    %c0_2 = arith.constant 0 : index
    %c0_3 = arith.constant 0 : index
    %7 = vector.load %arg3[%c0_2, %c0_3] : memref<1x128xf32, #tpu.memory_space<vmem>>, vector<1x128xf32>
    %8 = vector.broadcast %7 : vector<1x128xf32> to vector<8x128xf32>
    %9 = arith.addf %6, %8 : vector<8x128xf32>
    %cst_4 = arith.constant 0.000000e+00 : f32
    %10 = vector.broadcast %cst_4 : f32 to vector<8x128xf32>
    %11 = arith.maximumf %9, %10 : vector<8x128xf32>
    %12 = arith.truncf %11 : vector<8x128xf32> to vector<8x128xbf16>
    %c0_5 = arith.constant 0 : index
    %c0_6 = arith.constant 0 : index
    %13 = vector.load %arg4[%c0_5, %c0_6] : memref<128x128xbf16, #tpu.memory_space<vmem>>, vector<128x128xbf16>
    %cst_7 = arith.constant dense<0.000000e+00> : vector<8x128xf32>
    %14 = tpu.matmul %12, %13, %cst_7 {dimension_numbers = #tpu.dot_dimension_numbers<[1], [0], [0], [1], [0, 0, 1, 1], [], []>} : vector<8x128xbf16>, vector<128x128xbf16>, vector<8x128xf32> -> vector<8x128xf32>
    %c0_8 = arith.constant 0 : index
    %c0_9 = arith.constant 0 : index
    %15 = vector.load %arg5[%c0_8, %c0_9] : memref<1x128xf32, #tpu.memory_space<vmem>>, vector<1x128xf32>
    %16 = vector.broadcast %15 : vector<1x128xf32> to vector<8x128xf32>
    %17 = arith.addf %14, %16 : vector<8x128xf32>
    %cst_10 = arith.constant 0.000000e+00 : f32
    %18 = vector.broadcast %cst_10 : f32 to vector<8x128xf32>
    %19 = arith.maximumf %17, %18 : vector<8x128xf32>
    %20 = arith.truncf %19 : vector<8x128xf32> to vector<8x128xbf16>
    %c0_11 = arith.constant 0 : index
    %c0_12 = arith.constant 0 : index
    %21 = vector.load %arg6[%c0_11, %c0_12] : memref<128x128xbf16, #tpu.memory_space<vmem>>, vector<128x128xbf16>
    %cst_13 = arith.constant dense<0.000000e+00> : vector<8x128xf32>
    %22 = tpu.matmul %20, %21, %cst_13 {dimension_numbers = #tpu.dot_dimension_numbers<[1], [0], [0], [1], [0, 0, 1, 1], [], []>} : vector<8x128xbf16>, vector<128x128xbf16>, vector<8x128xf32> -> vector<8x128xf32>
    %c0_14 = arith.constant 0 : index
    %c0_15 = arith.constant 0 : index
    %23 = vector.load %arg7[%c0_14, %c0_15] : memref<1x128xf32, #tpu.memory_space<vmem>>, vector<1x128xf32>
    %24 = vector.broadcast %23 : vector<1x128xf32> to vector<8x128xf32>
    %25 = arith.addf %22, %24 : vector<8x128xf32>
    %26 = vector.extract_strided_slice %25 {offsets = [0, 0], sizes = [8, 4], strides = [1, 1]} : vector<8x128xf32> to vector<8x4xf32>
    %27 = arith.index_cast %1 : i32 to index
    %c0_16 = arith.constant 0 : index
    %28 = vector.load %arg8[%27, %c0_16] : memref<8x4xf32, #tpu.memory_space<vmem>>, vector<8x4xf32>
    tpu.vector_store %arg8[%27, %c0_16], %26 {strides = array<i32>} : memref<8x4xf32, #tpu.memory_space<vmem>>, vector<8x4xf32>,
    %c1_i32 = arith.constant 1 : i32
    return
  }
  func.func @transform_0(%arg0: i32) -> (i32, i32) {
    %c0_i32 = arith.constant 0 : i32
    %c0_i32_0 = arith.constant 0 : i32
    return %arg0, %c0_i32 : i32, i32
  }
  func.func @transform_1(%arg0: i32) -> (i32, i32) {
    %c0_i32 = arith.constant 0 : i32
    %c0_i32_0 = arith.constant 0 : i32
    %c0_i32_1 = arith.constant 0 : i32
    return %c0_i32, %c0_i32_0 : i32, i32
  }
  func.func @transform_2(%arg0: i32) -> (i32, i32) {
    %c0_i32 = arith.constant 0 : i32
    %c0_i32_0 = arith.constant 0 : i32
    %c0_i32_1 = arith.constant 0 : i32
    return %c0_i32, %c0_i32_0 : i32, i32
  }
  func.func @transform_3(%arg0: i32) -> (i32, i32) {
    %c0_i32 = arith.constant 0 : i32
    %c0_i32_0 = arith.constant 0 : i32
    %c0_i32_1 = arith.constant 0 : i32
    return %c0_i32, %c0_i32_0 : i32, i32
  }
  func.func @transform_4(%arg0: i32) -> (i32, i32) {
    %c0_i32 = arith.constant 0 : i32
    %c0_i32_0 = arith.constant 0 : i32
    %c0_i32_1 = arith.constant 0 : i32
    return %c0_i32, %c0_i32_0 : i32, i32
  }
  func.func @transform_5(%arg0: i32) -> (i32, i32) {
    %c0_i32 = arith.constant 0 : i32
    %c0_i32_0 = arith.constant 0 : i32
    %c0_i32_1 = arith.constant 0 : i32
    return %c0_i32, %c0_i32_0 : i32, i32
  }
  func.func @transform_6(%arg0: i32) -> (i32, i32) {
    %c0_i32 = arith.constant 0 : i32
    %c0_i32_0 = arith.constant 0 : i32
    %c0_i32_1 = arith.constant 0 : i32
    return %c0_i32, %c0_i32_0 : i32, i32
  }
  func.func @transform_7(%arg0: i32) -> (i32, i32) {
    %c0_i32 = arith.constant 0 : i32
    %c0_i32_0 = arith.constant 0 : i32
    return %arg0, %c0_i32 : i32, i32
  }
}

</mosaic_0001>

<bundles_post_ra>
// kernel: tpu_custom_call.1
= control target key start
LH: loop header
LB: loop body
LE: loop exit
PB: predicated region body
PF: predicated region fallthrough
CT: control target
= control target key end

     0   :  { %12 = vsyncpa [#allocation3], 0  ;;  %s675_s0 = inlined_call_operand.hbm [shape: f32[8,16], index: 0, kind: input, shape index: {}]   ;;  %s676_s1 = inlined_call_operand.hbm [shape: bf16[16,128], index: 1, kind: input, shape index: {}]   ;;  %s677_s2 = inlined_call_operand.vmem [shape: f32[1,128], index: 2, kind: input, shape index: {}]   ;;  %s678_s3 = inlined_call_operand.hbm [shape: bf16[128,128], index: 3, kind: input, shape index: {}]   ;;  %s679_s4 = inlined_call_operand.vmem [shape: f32[1,128], index: 4, kind: input, shape index: {}]   ;;  %s680_s5 = inlined_call_operand.hbm [shape: bf16[128,128], index: 5, kind: input, shape index: {}]   ;;  %s681_s6 = inlined_call_operand.vmem [shape: f32[1,128], index: 6, kind: input, shape index: {}]   ;;  %s682_s7 = inlined_call_operand.vmem [shape: f32[8,4], index: 7, kind: output, shape index: {}]  }
   0x1   :  { %13 = vsyncpa [#allocation5], 0 }
   0x2   :  { %14 = vsyncpa [#allocation8], 0  ;;  %s574_s24 = smov [#allocation4]  }
   0x3   :  { %s30_s25 = sshll.u32 %s574_s24, 4  ;;  %s31_s25 = int_to_ptr.vmem [resolvable:$true] %s30_s25 }
   0x4   :  { %s496_s26 = scalar_lea.vmem %s31_s25, 128  ;;  %p501_p1 = scmp.lt.s32.totalorder %s31_s25, %s31_s25 }
   0x5   :  { %p497_p0 = scmp.ne.s32.totalorder %s31_s25, %s496_s26  ;;  %p502_p2 = scmp.lt.s32.totalorder %s496_s26, %s496_s26 }
   0x7   :  { %p503_p3 = por %p502_p2, %p501_p1 }
   0x9   :  { %p504_p4 = pnand %p503_p3, %p497_p0 }
   0xb   :  { %507 = shalt.err (!%p504_p4)
}
   0xc   :  { %s575_s27 = smov 64   ;;  %s576_s28 = smov 4  }
   0xd   :  { %36 = dma.hbm_to_vmem [thread:$0]  %s676_s1, 128, %s31_s25, [#allocation5], %s575_s27, %s575_s27, %s576_s28  }
   0xe   :  { %s577_s8 = smov [#allocation2]   ;;  %s578_s10 = smov [#allocation6]  }
   0xf   :  { %s21_s9 = sshll.u32 %s577_s8, 4  ;;  %s44_s11 = sshll.u32 %s578_s10, 4  ;;  %s22_s9 = int_to_ptr.vmem [resolvable:$true] %s21_s9  ;;  %s45_s11 = int_to_ptr.vmem [resolvable:$true] %s44_s11 }
  0x10   :  { %s516_s12 = scalar_lea.vmem %s22_s9, 128  ;;  %p521_p6 = scmp.lt.s32.totalorder %s22_s9, %s22_s9 }
  0x11   :  { %p517_p5 = scmp.ne.s32.totalorder %s22_s9, %s516_s12  ;;  %p522_p7 = scmp.lt.s32.totalorder %s516_s12, %s516_s12 }
  0x13   :  { %p523_p8 = por %p522_p7, %p521_p6 }
  0x15   :  { %p524_p9 = pnand %p523_p8, %p517_p5 }
  0x17   :  { %527 = shalt.err (!%p524_p9)
}
  0x18   :  { %24 = dma.hbm_to_vmem [thread:$0]  %s675_s0, 128, %s22_s9, [#allocation3]  }
  0x19   :  { %s536_s15 = scalar_lea.vmem %s45_s11, 1024  ;;  %p541_p11 = scmp.lt.s32.totalorder %s45_s11, %s45_s11 }
  0x1a   :  { %p537_p10 = scmp.ne.s32.totalorder %s45_s11, %s536_s15  ;;  %p542_p12 = scmp.lt.s32.totalorder %s536_s15, %s536_s15 }
  0x1c   :  { %p543_p13 = por %p542_p12, %p541_p11 }
  0x1e   :  { %p544_p0 = pnand %p543_p13, %p537_p10 }
  0x20   :  { %547 = shalt.err (!%p544_p0)
}
  0x21   :  { %50 = dma.hbm_to_vmem [thread:$0]  %s678_s3, 1024, %s45_s11, [#allocation5], %s575_s27, %s575_s27, %s576_s28  }
  0x22   :  { %s579_s17 = smov [#allocation7]  }
  0x23   :  { %s58_s18 = sshll.u32 %s579_s17, 4  ;;  %s59_s18 = int_to_ptr.vmem [resolvable:$true] %s58_s18 }
  0x24   :  { %s556_s19 = scalar_lea.vmem %s59_s18, 1024  ;;  %p561_p2 = scmp.lt.s32.totalorder %s59_s18, %s59_s18 }
  0x25   :  { %p557_p1 = scmp.ne.s32.totalorder %s59_s18, %s556_s19  ;;  %p562_p3 = scmp.lt.s32.totalorder %s556_s19, %s556_s19 }
  0x27   :  { %p563_p4 = por %p562_p3, %p561_p2 }
  0x29   :  { %p564_p5 = pnand %p563_p4, %p557_p1 }
  0x2b   :  { %567 = shalt.err (!%p564_p5)
}
  0x2c   :  { %64 = dma.hbm_to_vmem [thread:$0]  %s680_s5, 1024, %s59_s18, [#allocation8], %s575_s27, %s575_s27, %s576_s28  }
  0x2d   :  { %568 = dma.done.wait [#allocation3], 128  }
  0x2e   :  { %569 = vsyncadd [#allocation3], 4294967168 }
  0x2f   :  { %570 = dma.done.wait [#allocation5], 1152  }
  0x30   :  { %571 = vsyncadd [#allocation5], 4294966144 }
  0x31   :  { %572 = dma.done.wait [#allocation8], 1024  }
  0x32   :  { %573 = vsyncadd [#allocation8], 4294966272  ;;  %v580_v0 = vmov 0.0   ;;  %vm581_vm0 = vmmov 0   ;;  %v471_v1 = vld [vmem:[#allocation4] sm:$0xff]   ;;  %v80_v2 = vld [vmem:[#allocation2] sm:$0xff] }
  0x33   :  { %417 = vmatprep.subr.bf16.mxu0 %v580_v0  ;;  %419 = vmatprep.mubr.msk.bf16.mxu0 %vm581_vm0, %v580_v0  ;;  %v81_v3 = vpack.c.bf16 %v80_v2, %v80_v2  ;;  %vm97_vm1 = vcmask 130048   ;;  %v472_v4 = vld [vmem:[#allocation6 + $0x38] sm:$0xff]   ;;  %v473_v5 = vld [vmem:[#allocation6 + $0x30] sm:$0xff]   ;;  %v474_v6 = vld [vmem:[#allocation6 + $0x28] sm:$0xff]   ;;  %vm367_vm2 = vcmask 31744  }
  0x34   :  { %423 = vmatprep.subr.bf16.mxu1 %v580_v0  ;;  %439 = vmatprep.mubr.msk.bf16.mxu1 %vm581_vm0, %v580_v0  ;;  %v475_v7 = vld [vmem:[#allocation6 + $0x20] sm:$0xff]   ;;  %v476_v8 = vld [vmem:[#allocation6 + $0x18] sm:$0xff]   ;;  %v477_v9 = vld [vmem:[#allocation6 + $0x10] sm:$0xff]  }
  0x35   :  { %418 = vmatpush3.bf16.msra.mxu0 %v471_v1  ;;  %424 = vmatpush3.bf16.msra.mxu1 %v472_v4  ;;  %v478_v10 = vld [vmem:[#allocation6 + $0x8] sm:$0xff]   ;;  %v479_v11 = vld [vmem:[#allocation6] sm:$0xff]   ;;  %v480_v12 = vld [vmem:[#allocation7 + $0x38] sm:$0xff]  }
  0x36   :  { %443 = vmatprep.subr.bf16.mxu0 %v580_v0  ;;  %425 = vmatprep.subr.bf16.mxu1 %v580_v0  ;;  %v481_v13 = vld [vmem:[#allocation7 + $0x30] sm:$0xff]   ;;  %v482_v14 = vld [vmem:[#allocation7 + $0x28] sm:$0xff]   ;;  %v483_v15 = vld [vmem:[#allocation7 + $0x20] sm:$0xff]  }
  0x37   :  { %v484_v16 = vld [vmem:[#allocation7 + $0x18] sm:$0xff]   ;;  %v485_v17 = vld [vmem:[#allocation7 + $0x10] sm:$0xff]   ;;  %v486_v26 = vld [vmem:[#allocation7 + $0x8] sm:$0xff]  }
  0x38   :  { %420 = vmatmul.mubr.msk.bf16.vlgmr.msra.gmra.mxu0 %vm97_vm1, %v81_v3  ;;  %v376_v18 = vld [vmem:[%s677_s2] ss:$0 sm:$0xff]  ;;  %v487_v27 = vld [vmem:[#allocation7] sm:$0xff]  }
  0x39   :  { %459 = vmatprep.mubr.msk.bf16.mxu0 %vm581_vm0, %v580_v0  ;;  %426 = vmatpush3.bf16.msra.mxu1 %v473_v5  ;;  %v379_v28 = vld [vmem:[%s679_s4] ss:$0 sm:$0xff] }
  0x3a   :  { %427 = vmatprep.subr.bf16.mxu1 %v580_v0  ;;  %444 = vmatpush3.bf16.msra.mxu0 %v480_v12  ;;  %v388_v36 = vld [vmem:[%s681_s6] ss:$0 sm:$0xff] }
  0x3b   :  { %445 = vmatprep.subr.bf16.mxu0 %v580_v0 }
  0x3d   :  { %428 = vmatpush3.bf16.msra.mxu1 %v474_v6 }
  0x3e   :  { %429 = vmatprep.subr.bf16.mxu1 %v580_v0  ;;  %446 = vmatpush3.bf16.msra.mxu0 %v481_v13 }
  0x3f   :  { %447 = vmatprep.subr.bf16.mxu0 %v580_v0 }
  0x41   :  { %430 = vmatpush3.bf16.msra.mxu1 %v475_v7 }
  0x42   :  { %431 = vmatprep.subr.bf16.mxu1 %v580_v0  ;;  %448 = vmatpush3.bf16.msra.mxu0 %v482_v14 }
  0x43   :  { %449 = vmatprep.subr.bf16.mxu0 %v580_v0 }
  0x45   :  { %432 = vmatpush3.bf16.msra.mxu1 %v476_v8 }
  0x46   :  { %433 = vmatprep.subr.bf16.mxu1 %v580_v0  ;;  %450 = vmatpush3.bf16.msra.mxu0 %v483_v15 }
  0x47   :  { %451 = vmatprep.subr.bf16.mxu0 %v580_v0 }
  0x49   :  { %434 = vmatpush3.bf16.msra.mxu1 %v477_v9 }
  0x4a   :  { %435 = vmatprep.subr.bf16.mxu1 %v580_v0  ;;  %452 = vmatpush3.bf16.msra.mxu0 %v484_v16 }
  0x4b   :  { %453 = vmatprep.subr.bf16.mxu0 %v580_v0 }
  0x4d   :  { %436 = vmatpush3.bf16.msra.mxu1 %v478_v10 }
  0x4e   :  { %437 = vmatprep.subr.bf16.mxu1 %v580_v0  ;;  %454 = vmatpush3.bf16.msra.mxu0 %v485_v17 }
  0x4f   :  { %455 = vmatprep.subr.bf16.mxu0 %v580_v0 }
  0x51   :  { %438 = vmatpush3.bf16.msra.mxu1 %v479_v11 }
  0x52   :  { %456 = vmatpush3.bf16.msra.mxu0 %v486_v26 }
  0x53   :  { %457 = vmatprep.subr.bf16.mxu0 %v580_v0 }
  0x56   :  { %458 = vmatpush3.bf16.msra.mxu0 %v487_v27 }
  0xf8   :  { %v135_v19 = vpop.f32.mrf.mxu0 }
  0xf9   :  { %v136_v20 = vadd.f32 %v376_v18, %v135_v19 }
  0xfa   :  { %v421_v21 = vpop.f32.mrf.mxu0 }
  0xfb   :  { %v141_v22 = vmax.f32 %v136_v20, 0.0 }
  0xfc   :  { %v138_v23 = vpop.f32.mrf.mxu0 }
  0xfd   :  { %v142_v24 = vpack.c.bf16 %v141_v22, %v141_v22 }
  0xfe   :  { %v422_v25 = vpop.f32.mrf.mxu0 }
  0xff   :  { %440 = vmatmul.mubr.bf16.vlgmr.msra.gmra.mxu1 %v142_v24 }
 0x1bf   :  { %v248_v29 = vpop.f32.mrf.mxu1 }
 0x1c0   :  { %v249_v30 = vadd.f32 %v379_v28, %v248_v29 }
 0x1c1   :  { %v441_v31 = vpop.f32.mrf.mxu1 }
 0x1c2   :  { %v254_v32 = vmax.f32 %v249_v30, 0.0 }
 0x1c3   :  { %v251_v33 = vpop.f32.mrf.mxu1 }
 0x1c4   :  { %v255_v34 = vpack.c.bf16 %v254_v32, %v254_v32 }
 0x1c5   :  { %v442_v35 = vpop.f32.mrf.mxu1 }
 0x1c6   :  { %460 = vmatmul.mubr.bf16.vlgmr.msra.gmra.mxu0 %v255_v34 }
 0x286   :  { %v361_v37 = vpop.f32.mrf.mxu0 }
 0x287   :  { %v362_v38 = vadd.f32 %v388_v36, %v361_v37 }
 0x288   :  { %v461_v39 = vpop.f32.mrf.mxu0 }
 0x289   :  { %368 = vst.msk [vmem:[%s682_s7] sm:$0xff] %vm367_vm2, %v362_v38 }
 0x28a   :  { %v364_v40 = vpop.f32.mrf.mxu0 }
 0x28c   :  { %v462_v41 = vpop.f32.mrf.mxu0 }
 0x28d   :  { %373 = vsyncpa [#allocation3], 1 }
 0x28e   :  { %374 = vsyncpa [#allocation5], 1 }
 0x28f   :  { %375 = vsyncpa [#allocation8], 1 }

</bundles_post_ra>
